<compile_context>
chip_gen: v6e
topology: v6e:2x2x1
jax: 0.10.0
libtpu: 0.0.40
codegen_flags: <defaults>
</compile_context>

<pallas_src>
import functools

import jax
import jax.numpy as jnp
from jax.experimental import pallas as pl
from jax.experimental.pallas import tpu as pltpu

_LANES = 128
_ROW_GRANULE = 32   # covers f32 (8,128), bf16 (16,128) and int8 (32,128) packing


def _masked_bce_kernel(pred_ref, target_ref, mask_ref, loss_ref, msum_ref, *,
                       steps_per_core, n_valid):
    c = pl.program_id(0)          # TensorCore shard (parallel axis)
    i = pl.program_id(1)          # streaming step within the shard (reduction)

    @pl.when(i == 0)
    def _init():
        loss_ref[...] = jnp.zeros_like(loss_ref)
        msum_ref[...] = jnp.zeros_like(msum_ref)

    block_rows = pred_ref.shape[0]

    m = mask_ref[...].astype(jnp.float32)
    x = pred_ref[...].astype(jnp.float32) * m          # pred * mask_ (masked logits)
    y = target_ref[...].astype(jnp.float32)

    # Numerically stable BCE-with-logits (torch's log1p formulation):
    #   l = max(x, 0) - x*y + log1p(exp(-|x|))
    per_elem = jnp.maximum(x, 0.0) - x * y + jnp.log1p(jnp.exp(-jnp.abs(x)))

    # Validity mask: zeroes (a) the host pad past the true element count,
    # (b) garbage from a partially out-of-bounds last block, and (c) dummy
    # blocks of the second core shard when the block count is odd.  Pure VALU
    # work (no EUP, no XLU), fully hidden under the DMA/EUP cost.
    g = c * steps_per_core + i                          # unclamped global block id
    base = g * (block_rows * _LANES)
    row_ids = jax.lax.broadcasted_iota(jnp.int32, (block_rows, _LANES), 0)
    lane_ids = jax.lax.broadcasted_iota(jnp.int32, (block_rows, _LANES), 1)
    valid = (base + row_ids * _LANES + lane_ids) < n_valid
    per_elem = jnp.where(valid, per_elem, 0.0)
    m = jnp.where(valid, m, 0.0)

    # (8,128) vreg accumulation: sublane-aligned reshape + elementwise adds only.
    loss_ref[...] += per_elem.reshape(1, -1, 8, _LANES).sum(axis=1)
    msum_ref[...] += m.reshape(1, -1, 8, _LANES).sum(axis=1)


@functools.partial(jax.jit, static_argnames=("tile_rows",))
def masked_nll_loss(pred, target, mask, *, tile_rows=2048):
    """pred: [batch*seq_len, n_classes(=1)] logits; target: [batch*seq_len];
    mask: [batch, seq_len].  Returns the scalar masked BCE-with-logits loss.
    Note: sum(mask) == 0 yields inf/nan, matching the PyTorch module."""
    pred_flat = pred.reshape(-1)
    target_flat = target.reshape(-1)
    mask_flat = mask.reshape(-1)
    n = pred_flat.shape[0]
    if target_flat.shape[0] != n or mask_flat.shape[0] != n:
        raise ValueError("flattened pred, target and mask must have equal sizes")
    if tile_rows % _ROW_GRANULE:
        raise ValueError("tile_rows must be a multiple of 32")

    # Lane-dense [rows, 128] view.  Pad only to the 32x128 layout granule
    # (decoupled from the tile size); correctness never relies on pad values.
    rows_needed = pl.cdiv(n, _LANES)
    rows_padded = pl.cdiv(rows_needed, _ROW_GRANULE) * _ROW_GRANULE
    padded_n = rows_padded * _LANES

    block_rows = min(int(tile_rows), rows_padded)       # multiple of 32 either way
    num_blocks = pl.cdiv(rows_padded, block_rows)
    num_cores = 2 if num_blocks >= 2 else 1             # v7x dual-TC split
    steps_per_core = pl.cdiv(num_blocks, num_cores)

    def prep(a):
        if a.dtype == jnp.bool_:
            a = a.astype(jnp.int8)                      # keep narrow; f32 only in vregs
        if padded_n != n:
            a = jnp.pad(a, (0, padded_n - n))           # <= one 32x128 granule
        return a.reshape(rows_padded, _LANES)

    pred2d = prep(pred_flat)
    targ2d = prep(target_flat)
    mask2d = prep(mask_flat)

    kernel = functools.partial(_masked_bce_kernel,
                               steps_per_core=steps_per_core, n_valid=n)

    def in_map(c, i):
        # Clamp so the DMA of a dummy block (odd block count split over two
        # cores) never starts fully out of bounds; its contribution is
        # discarded by the in-kernel validity mask.
        return (jnp.minimum(c * steps_per_core + i, num_blocks - 1), 0)

    acc_shape = jax.ShapeDtypeStruct((num_cores, 8, _LANES), jnp.float32)
    cost = pl.CostEstimate(
        flops=10 * padded_n,
        transcendentals=2 * padded_n,
        bytes_accessed=(pred2d.dtype.itemsize + targ2d.dtype.itemsize
                        + mask2d.dtype.itemsize) * padded_n
                       + 2 * num_cores * 8 * _LANES * 4,
    )

    loss_parts, mask_parts = pl.pallas_call(
        kernel,
        out_shape=(acc_shape, acc_shape),
        grid_spec=pltpu.PrefetchScalarGridSpec(
            num_scalar_prefetch=0,
            grid=(num_cores, steps_per_core),
            in_specs=[
                pl.BlockSpec((block_rows, _LANES), in_map),   # pred
                pl.BlockSpec((block_rows, _LANES), in_map),   # target
                pl.BlockSpec((block_rows, _LANES), in_map),   # mask
            ],
            out_specs=(
                pl.BlockSpec((1, 8, _LANES), lambda c, i: (c, 0, 0)),  # loss partials
                pl.BlockSpec((1, 8, _LANES), lambda c, i: (c, 0, 0)),  # mask partials
            ),
        ),
        compiler_params=pltpu.CompilerParams(
            dimension_semantics=("parallel", "arbitrary")),
        cost_estimate=cost,
    )(pred2d, targ2d, mask2d)

    # Tiny final reduction + normalisation (2 x num_cores x 1024 floats).
    return loss_parts.sum() / mask_parts.sum()


def _reference(pred, target, mask):
    """Pure-JAX mirror of the PyTorch module (weight=None path)."""
    x = pred.reshape(-1).astype(jnp.float32) * mask.reshape(-1).astype(jnp.float32)
    y = target.reshape(-1).astype(jnp.float32)
    per = jnp.maximum(x, 0.0) - x * y + jnp.log1p(jnp.exp(-jnp.abs(x)))
    return jnp.sum(per) / jnp.sum(mask.astype(jnp.float32))


if __name__ == "__main__":
    batch, seq_len, n_classes = 2, 8, 1

    key = jax.random.PRNGKey(0)
    kp, kt, km = jax.random.split(key, 3)

    pred = jax.random.normal(kp, (batch * seq_len, n_classes), jnp.float32)
    target = jax.random.bernoulli(kt, 0.5, (batch * seq_len,)).astype(jnp.float32)
    mask = jax.random.bernoulli(km, 0.7, (batch, seq_len)).astype(jnp.float32)
    mask = mask.at[0, 0].set(1.0)  # guarantee sum(mask) > 0

    loss = masked_nll_loss(pred, target, mask)
    loss = jax.block_until_ready(loss)

    ref = _reference(pred, target, mask)
    assert loss.shape == ()
    assert jnp.allclose(loss, ref, atol=1e-5, rtol=1e-5), (float(loss), float(ref))

    print("KERNEL_OK")
</pallas_src>

<mosaic_0001>
module attributes {stable_mosaic.version = 11 : i64} {
  func.func @_masked_bce_kernel(%arg0: i32, %arg1: i32, %arg2: memref<32x128xf32, #tpu.memory_space<vmem>>, %arg3: memref<32x128xf32, #tpu.memory_space<vmem>>, %arg4: memref<32x128xf32, #tpu.memory_space<vmem>>, %arg5: memref<1x8x128xf32, #tpu.memory_space<vmem>>, %arg6: memref<1x8x128xf32, #tpu.memory_space<vmem>>) attributes {dimension_semantics = [#tpu.dimension_semantics<parallel>, #tpu.dimension_semantics<arbitrary>], iteration_bounds = array<i64: 1, 1>, scalar_prefetch = 0 : i64, scratch_operands = 0 : i64, tpu.core_type = #tpu.core_type<tc>, window_params = [{transform_indices = @transform_0, window_bounds = array<i64: 32, 128>}, {transform_indices = @transform_1, window_bounds = array<i64: 32, 128>}, {transform_indices = @transform_2, window_bounds = array<i64: 32, 128>}, {transform_indices = @transform_3, window_bounds = array<i64: 1, 8, 128>}, {transform_indices = @transform_4, window_bounds = array<i64: 1, 8, 128>}]} {
    %c0_i32 = arith.constant 0 : i32
    %0 = arith.cmpi eq, %arg1, %c0_i32 : i32
    %1 = arith.extui %0 : i1 to i32
    %c0_i32_0 = arith.constant 0 : i32
    %2 = arith.cmpi ne, %1, %c0_i32_0 : i32
    scf.if %2 {
      %cst_23 = arith.constant 0.000000e+00 : f32
      %43 = vector.broadcast %cst_23 : f32 to vector<1x8x128xf32>
      %c0_24 = arith.constant 0 : index
      %c0_25 = arith.constant 0 : index
      %c0_26 = arith.constant 0 : index
      %44 = vector.load %arg5[%c0_24, %c0_25, %c0_26] : memref<1x8x128xf32, #tpu.memory_space<vmem>>, vector<1x8x128xf32>
      tpu.vector_store %arg5[%c0_24, %c0_25, %c0_26], %43 {strides = array<i32>} : memref<1x8x128xf32, #tpu.memory_space<vmem>>, vector<1x8x128xf32>,
      %cst_27 = arith.constant 0.000000e+00 : f32
      %45 = vector.broadcast %cst_27 : f32 to vector<1x8x128xf32>
      %c0_28 = arith.constant 0 : index
      %c0_29 = arith.constant 0 : index
      %c0_30 = arith.constant 0 : index
      %46 = vector.load %arg6[%c0_28, %c0_29, %c0_30] : memref<1x8x128xf32, #tpu.memory_space<vmem>>, vector<1x8x128xf32>
      tpu.vector_store %arg6[%c0_28, %c0_29, %c0_30], %45 {strides = array<i32>} : memref<1x8x128xf32, #tpu.memory_space<vmem>>, vector<1x8x128xf32>,
    } else {
    }
    %c0 = arith.constant 0 : index
    %c0_1 = arith.constant 0 : index
    %3 = vector.load %arg4[%c0, %c0_1] : memref<32x128xf32, #tpu.memory_space<vmem>>, vector<32x128xf32>
    %c0_2 = arith.constant 0 : index
    %c0_3 = arith.constant 0 : index
    %4 = vector.load %arg2[%c0_2, %c0_3] : memref<32x128xf32, #tpu.memory_space<vmem>>, vector<32x128xf32>
    %5 = arith.mulf %4, %3 : vector<32x128xf32>
    %c0_4 = arith.constant 0 : index
    %c0_5 = arith.constant 0 : index
    %6 = vector.load %arg3[%c0_4, %c0_5] : memref<32x128xf32, #tpu.memory_space<vmem>>, vector<32x128xf32>
    %cst = arith.constant 0.000000e+00 : f32
    %7 = vector.broadcast %cst : f32 to vector<32x128xf32>
    %8 = arith.maximumf %5, %7 : vector<32x128xf32>
    %9 = arith.mulf %5, %6 : vector<32x128xf32>
    %10 = arith.subf %8, %9 : vector<32x128xf32>
    %11 = math.absf %5 : vector<32x128xf32>
    %cst_6 = arith.constant 0.000000e+00 : f32
    %12 = vector.broadcast %cst_6 : f32 to vector<32x128xf32>
    %13 = arith.subf %12, %11 : vector<32x128xf32>
    %14 = math.exp %13 : vector<32x128xf32>
    %15 = math.log1p %14 : vector<32x128xf32>
    %16 = arith.addf %10, %15 : vector<32x128xf32>
    %c1_i32 = arith.constant 1 : i32
    %17 = arith.muli %arg0, %c1_i32 : i32
    %18 = arith.addi %17, %arg1 : i32
    %c4096_i32 = arith.constant 4096 : i32
    %19 = arith.muli %18, %c4096_i32 : i32
    %20 = tpu.iota {dimensions = array<i32: 0>} : vector<32x128xi32>
    %21 = tpu.iota {dimensions = array<i32: 1>} : vector<32x128xi32>
    %c128_i32 = arith.constant 128 : i32
    %22 = vector.broadcast %c128_i32 : i32 to vector<32x128xi32>
    %23 = arith.muli %20, %22 : vector<32x128xi32>
    %24 = vector.broadcast %19 : i32 to vector<32x128xi32>
    %25 = arith.addi %24, %23 : vector<32x128xi32>
    %26 = arith.addi %25, %21 : vector<32x128xi32>
    %c16_i32 = arith.constant 16 : i32
    %27 = vector.broadcast %c16_i32 : i32 to vector<32x128xi32>
    %28 = arith.cmpi slt, %26, %27 : vector<32x128xi32>
    %cst_7 = arith.constant 0.000000e+00 : f32
    %29 = vector.broadcast %cst_7 : f32 to vector<32x128xf32>
    %30 = arith.select %28, %16, %29 : vector<32x128xi1>, vector<32x128xf32>
    %cst_8 = arith.constant 0.000000e+00 : f32
    %31 = vector.broadcast %cst_8 : f32 to vector<32x128xf32>
    %32 = arith.select %28, %3, %31 : vector<32x128xi1>, vector<32x128xf32>
    %c0_9 = arith.constant 0 : index
    %c0_10 = arith.constant 0 : index
    %c0_11 = arith.constant 0 : index
    %33 = vector.load %arg5[%c0_9, %c0_10, %c0_11] : memref<1x8x128xf32, #tpu.memory_space<vmem>>, vector<1x8x128xf32>
    %34 = vector.shape_cast %30 : vector<32x128xf32> to vector<1x4x8x128xf32>
    %cst_12 = arith.constant dense<0.000000e+00> : vector<1x8x128xf32>
    %35 = vector.multi_reduction <add>, %34, %cst_12 [1] : vector<1x4x8x128xf32> to vector<1x8x128xf32>
    %36 = arith.addf %33, %35 : vector<1x8x128xf32>
    %c0_13 = arith.constant 0 : index
    %c0_14 = arith.constant 0 : index
    %c0_15 = arith.constant 0 : index
    %37 = vector.load %arg5[%c0_13, %c0_14, %c0_15] : memref<1x8x128xf32, #tpu.memory_space<vmem>>, vector<1x8x128xf32>
    tpu.vector_store %arg5[%c0_13, %c0_14, %c0_15], %36 {strides = array<i32>} : memref<1x8x128xf32, #tpu.memory_space<vmem>>, vector<1x8x128xf32>,
    %c0_16 = arith.constant 0 : index
    %c0_17 = arith.constant 0 : index
    %c0_18 = arith.constant 0 : index
    %38 = vector.load %arg6[%c0_16, %c0_17, %c0_18] : memref<1x8x128xf32, #tpu.memory_space<vmem>>, vector<1x8x128xf32>
    %39 = vector.shape_cast %32 : vector<32x128xf32> to vector<1x4x8x128xf32>
    %cst_19 = arith.constant dense<0.000000e+00> : vector<1x8x128xf32>
    %40 = vector.multi_reduction <add>, %39, %cst_19 [1] : vector<1x4x8x128xf32> to vector<1x8x128xf32>
    %41 = arith.addf %38, %40 : vector<1x8x128xf32>
    %c0_20 = arith.constant 0 : index
    %c0_21 = arith.constant 0 : index
    %c0_22 = arith.constant 0 : index
    %42 = vector.load %arg6[%c0_20, %c0_21, %c0_22] : memref<1x8x128xf32, #tpu.memory_space<vmem>>, vector<1x8x128xf32>
    tpu.vector_store %arg6[%c0_20, %c0_21, %c0_22], %41 {strides = array<i32>} : memref<1x8x128xf32, #tpu.memory_space<vmem>>, vector<1x8x128xf32>,
    return
  }
  func.func @transform_0(%arg0: i32, %arg1: i32) -> (i32, i32) {
    %c1_i32 = arith.constant 1 : i32
    %0 = arith.muli %arg0, %c1_i32 : i32
    %1 = arith.addi %0, %arg1 : i32
    %c0_i32 = arith.constant 0 : i32
    %2 = arith.minsi %1, %c0_i32 : i32
    %c0_i32_0 = arith.constant 0 : i32
    %c0_i32_1 = arith.constant 0 : i32
    return %2, %c0_i32_0 : i32, i32
  }
  func.func @transform_1(%arg0: i32, %arg1: i32) -> (i32, i32) {
    %c1_i32 = arith.constant 1 : i32
    %0 = arith.muli %arg0, %c1_i32 : i32
    %1 = arith.addi %0, %arg1 : i32
    %c0_i32 = arith.constant 0 : i32
    %2 = arith.minsi %1, %c0_i32 : i32
    %c0_i32_0 = arith.constant 0 : i32
    %c0_i32_1 = arith.constant 0 : i32
    return %2, %c0_i32_0 : i32, i32
  }
  func.func @transform_2(%arg0: i32, %arg1: i32) -> (i32, i32) {
    %c1_i32 = arith.constant 1 : i32
    %0 = arith.muli %arg0, %c1_i32 : i32
    %1 = arith.addi %0, %arg1 : i32
    %c0_i32 = arith.constant 0 : i32
    %2 = arith.minsi %1, %c0_i32 : i32
    %c0_i32_0 = arith.constant 0 : i32
    %c0_i32_1 = arith.constant 0 : i32
    return %2, %c0_i32_0 : i32, i32
  }
  func.func @transform_3(%arg0: i32, %arg1: i32) -> (i32, i32, i32) {
    %c0_i32 = arith.constant 0 : i32
    %c0_i32_0 = arith.constant 0 : i32
    %c0_i32_1 = arith.constant 0 : i32
    return %arg0, %c0_i32, %c0_i32_0 : i32, i32, i32
  }
  func.func @transform_4(%arg0: i32, %arg1: i32) -> (i32, i32, i32) {
    %c0_i32 = arith.constant 0 : i32
    %c0_i32_0 = arith.constant 0 : i32
    %c0_i32_1 = arith.constant 0 : i32
    return %arg0, %c0_i32, %c0_i32_0 : i32, i32, i32
  }
}

</mosaic_0001>

<bundles_post_ra>
// kernel: masked_nll_loss.1
= control target key start
LH: loop header
LB: loop body
LE: loop exit
PB: predicated region body
PF: predicated region fallthrough
CT: control target
= control target key end

     0   :  { %v204_v0 = vlaneseq  ;;  %s418_s0 = inlined_call_operand.vmem [shape: f32[32,128], index: 0, kind: input, shape index: {}]   ;;  %s419_s2 = inlined_call_operand.vmem [shape: f32[32,128], index: 2, kind: input, shape index: {}]   ;;  %s420_s4 = inlined_call_operand.vmem [shape: f32[1,8,128], index: 4, kind: output, shape index: {1}]   ;;  %s421_s1 = inlined_call_operand.vmem [shape: f32[32,128], index: 1, kind: input, shape index: {}]   ;;  %s422_s3 = inlined_call_operand.vmem [shape: f32[1,8,128], index: 3, kind: output, shape index: {0}]  }
   0x1   :  { %v118_v1 = vld [vmem:[%s419_s2] sm:$0xff]  ;;  %v119_v2 = vld [vmem:[%s419_s2 + $0x8] sm:$0xff]  ;;  %v120_v3 = vld [vmem:[%s419_s2 + $0x10] sm:$0xff] }
   0x2   :  { %v121_v4 = vld [vmem:[%s419_s2 + $0x18] sm:$0xff]  ;;  %v122_v5 = vld [vmem:[%s418_s0] sm:$0xff]  ;;  %v123_v6 = vld [vmem:[%s418_s0 + $0x8] sm:$0xff]  ;;  %v205_v7 = vshrl.u32 %v204_v0, 7  ;;  %v210_v18 = vand.u32 127, %v204_v0 }
   0x3   :  { %v124_v8 = vld [vmem:[%s418_s0 + $0x10] sm:$0xff]  ;;  %v125_v9 = vld [vmem:[%s418_s0 + $0x18] sm:$0xff]  ;;  %v340_v10 = vmul.f32 %v122_v5, %v118_v1  ;;  %v342_v11 = vmul.f32 %v123_v6, %v119_v2  ;;  %v130_v55 = vld [vmem:[%s421_s1] sm:$0xff] }
   0x4   :  { %v344_v12 = vmul.f32 %v124_v8, %v120_v3  ;;  %v346_v13 = vmul.f32 %v125_v9, %v121_v4  ;;  %v206_v14 = vadd.s32 8, %v205_v7  ;;  %v207_v15 = vadd.s32 16, %v205_v7  ;;  %v131_v57 = vld [vmem:[%s421_s1 + $0x8] sm:$0xff]  ;;  %v132_v58 = vld [vmem:[%s421_s1 + $0x10] sm:$0xff]  ;;  %v133_v61 = vld [vmem:[%s421_s1 + $0x18] sm:$0xff] }
   0x5   :  { %v146_v16 = vand.u32 2147483647, %v340_v10  ;;  %v147_v17 = vand.u32 2147483647, %v342_v11  ;;  %v208_v23 = vadd.s32 24, %v205_v7  ;;  %v211_v24 = vmul.u32 128, %v205_v7 }
   0x6   :  { %v148_v19 = vand.u32 2147483647, %v344_v12  ;;  %v149_v20 = vand.u32 2147483647, %v346_v13  ;;  %v212_v27 = vmul.u32 128, %v206_v14  ;;  %v213_v28 = vmul.u32 128, %v207_v15 }
   0x7   :  { %v150_v21 = vsub.f32 0.0, %v146_v16  ;;  %v151_v22 = vsub.f32 0.0, %v147_v17  ;;  %v214_v31 = vmul.u32 128, %v208_v23  ;;  %v352_v32 = vadd.s32 %v211_v24, %v210_v18 }
   0x8   :  { %v152_v25 = vsub.f32 0.0, %v148_v19  ;;  %v153_v26 = vsub.f32 0.0, %v149_v20  ;;  %v354_v35 = vadd.s32 %v212_v27, %v210_v18  ;;  %v356_v36 = vadd.s32 %v213_v28, %v210_v18 }
   0x9   :  { %v154_v29 = vmul.f32 1.442695, %v150_v21  ;;  %v156_v30 = vmul.f32 1.442695, %v151_v22  ;;  %v358_v37 = vadd.s32 %v214_v31, %v210_v18  ;;  %vm224_vm0 = vcmp.lt.s32.totalorder %v352_v32, 16 }
   0xa   :  { %v158_v33 = vmul.f32 1.442695, %v152_v25  ;;  %v160_v34 = vmul.f32 1.442695, %v153_v26  ;;  %vm225_vm1 = vcmp.lt.s32.totalorder %v354_v35, 16  ;;  %vm226_vm2 = vcmp.lt.s32.totalorder %v356_v36, 16 }
   0xb   :  { %275 = vpow2.f32 %v154_v29  ;;  %v232_v38 = vsel %vm224_vm0, %v118_v1, 0.0  ;;  %vm227_vm3 = vcmp.lt.s32.totalorder %v358_v37, 16  ;;  %v233_v39 = vsel %vm225_vm1, %v119_v2, 0.0 }
   0xc   :  { %277 = vpow2.f32 %v156_v30  ;;  %v234_v40 = vsel %vm226_vm2, %v120_v3, 0.0  ;;  %v243_v41 = vadd.f32 %v233_v39, %v232_v38  ;;  %v235_v42 = vsel %vm227_vm3, %v121_v4, 0.0 }
   0xd   :  { %279 = vpow2.f32 %v158_v33  ;;  %v134_v62 = vmax.f32 %v340_v10, 0.0  ;;  %v138_v63 = vmul.f32 %v130_v55, %v340_v10  ;;  %v135_v2 = vmax.f32 %v342_v11, 0.0 }
   0xe   :  { %281 = vpow2.f32 %v160_v34  ;;  %v244_v43 = vadd.f32 %v243_v41, %v234_v40  ;;  %v139_v3 = vmul.f32 %v131_v57, %v342_v11  ;;  %v136_v6 = vmax.f32 %v344_v12, 0.0 }
   0xf   :  { %v140_v7 = vmul.f32 %v132_v58, %v344_v12  ;;  %v137_v9 = vmax.f32 %v346_v13, 0.0  ;;  %v141_v14 = vmul.f32 %v133_v61, %v346_v13  ;;  %v142_v17 = vsub.f32 %v134_v62, %v138_v63 }
  0x10   :  { %v245_v44 = vadd.f32 %v244_v43, %v235_v42  ;;  %v143_v21 = vsub.f32 %v135_v2, %v139_v3 }
  0x11   :  { %v144_v13 = vsub.f32 %v136_v6, %v140_v7  ;;  %v145_v30 = vsub.f32 %v137_v9, %v141_v14 }
  0x12   :  { %247 = vst [vmem:[%s420_s4] sm:$0xff] %v245_v44 }
  0x18   :  { %v276_v45 = vpop.eup %275 }
  0x19   :  { %v278_v46 = vpop.eup %277  ;;  %v162_v47 = vadd.f32 1.0, %v276_v45  ;;  %v165_v53 = vmul.f32 -0.5, %v276_v45  ;;  %v168_v0 = vand.u32 2147483647, %v276_v45 }
  0x1a   :  { %v280_v48 = vpop.eup %279  ;;  %v171_v49 = vadd.f32 1.0, %v278_v46  ;;  %v174_v54 = vmul.f32 -0.5, %v278_v46  ;;  %v177_v4 = vand.u32 2147483647, %v278_v46 }
  0x1b   :  { %v282_v50 = vpop.eup %281  ;;  %283 = vlog2.f32 %v162_v47  ;;  %v180_v51 = vadd.f32 1.0, %v280_v48  ;;  %v183_v56 = vmul.f32 -0.5, %v280_v48  ;;  %v166_v59 = vadd.f32 1.0, %v165_v53 }
  0x1c   :  { %285 = vlog2.f32 %v171_v49  ;;  %v189_v52 = vadd.f32 1.0, %v282_v50  ;;  %v192_v60 = vmul.f32 -0.5, %v282_v50  ;;  %v175_v1 = vadd.f32 1.0, %v174_v54 }
  0x1d   :  { %287 = vlog2.f32 %v180_v51  ;;  %v184_v5 = vadd.f32 1.0, %v183_v56  ;;  %v186_v8 = vand.u32 2147483647, %v280_v48  ;;  %v167_v15 = vmul.f32 %v276_v45, %v166_v59 }
  0x1e   :  { %289 = vlog2.f32 %v189_v52  ;;  %v193_v16 = vadd.f32 1.0, %v192_v60  ;;  %vm395_vm4 = vcmp.lt.f32.partialorder %v168_v0, 0.0004427343  ;;  %v176_v11 = vmul.f32 %v278_v46, %v175_v1 }
  0x1f   :  { %v195_v19 = vand.u32 2147483647, %v282_v50  ;;  %vm399_vm5 = vcmp.lt.f32.partialorder %v177_v4, 0.0004427343  ;;  %v185_v23 = vmul.f32 %v280_v48, %v184_v5  ;;  %vm187_vm6 = vcmp.lt.f32.partialorder %v186_v8, 0.0004427343 }
  0x20   :  { %v194_v28 = vmul.f32 %v282_v50, %v193_v16 }
  0x21   :  { %vm196_vm7 = vcmp.lt.f32.partialorder %v195_v19, 0.0004427343 }
  0x28   :  { %v284_v10 = vpop.eup %283 }
  0x29   :  { %v286_v20 = vpop.eup %285  ;;  %v164_v22 = vmul.f32 0.6931472, %v284_v10 }
  0x2a   :  { %v288_v24 = vpop.eup %287  ;;  %v173_v25 = vmul.f32 0.6931472, %v286_v20 }
  0x2b   :  { %v170_v26 = vsel %vm395_vm4, %v167_v15, %v164_v22  ;;  %v182_v27 = vmul.f32 0.6931472, %v288_v24  ;;  %v290_v29 = vpop.eup %289 }
  0x2c   :  { %v179_v31 = vsel %vm399_vm5, %v176_v11, %v173_v25  ;;  %v198_v33 = vadd.f32 %v170_v26, %v142_v17  ;;  %v191_v38 = vmul.f32 0.6931472, %v290_v29 }
  0x2d   :  { %v188_v34 = vsel %vm187_vm6, %v185_v23, %v182_v27  ;;  %v199_v39 = vadd.f32 %v179_v31, %v143_v21 }
  0x2e   :  { %v200_v40 = vadd.f32 %v188_v34, %v144_v13  ;;  %v228_v41 = vsel %vm224_vm0, %v198_v33, 0.0  ;;  %v197_v42 = vsel %vm196_vm7, %v194_v28, %v191_v38 }
  0x2f   :  { %v229_v43 = vsel %vm225_vm1, %v199_v39, 0.0  ;;  %v201_v44 = vadd.f32 %v197_v42, %v145_v30 }
  0x30   :  { %v230_v45 = vsel %vm226_vm2, %v200_v40, 0.0  ;;  %v237_v46 = vadd.f32 %v229_v43, %v228_v41 }
  0x31   :  { %v231_v47 = vsel %vm227_vm3, %v201_v44, 0.0 }
  0x32   :  { %v238_v48 = vadd.f32 %v237_v46, %v230_v45 }
  0x34   :  { %v239_v49 = vadd.f32 %v238_v48, %v231_v47 }
  0x36   :  { %241 = vst [vmem:[%s422_s3] sm:$0xff] %v239_v49 }

</bundles_post_ra>
